<compile_context>
chip_gen: v5e
topology: v5e:2x2
jax: 0.10.0
libtpu: 0.0.40
codegen_flags: <defaults>
</compile_context>

<pallas_src>
import jax
import jax.numpy as jnp
from jax import lax
from jax.experimental import pallas as pl
from jax.experimental.pallas import tpu as pltpu


def logreg_kernel(x_ref, w_ref, b_ref, o_ref, acc_ref):
    k = pl.program_id(1)

    @pl.when(k == 0)
    def _init():
        acc_ref[...] = jnp.zeros_like(acc_ref)

    # x_ref: (TB, TK); w_ref: (D_out_p, TK) in PyTorch (out, in) layout.
    # Contract K against K without an explicit transpose (MXU takes the
    # transposed operand directly).
    acc_ref[...] += lax.dot_general(
        x_ref[...], w_ref[...],
        dimension_numbers=(((1,), (1,)), ((), ())),
        preferred_element_type=jnp.float32,
    )

    @pl.when(k == pl.num_programs(1) - 1)
    def _finalize():
        logits = acc_ref[...] + b_ref[...]            # (TB, TN) + (1, TN)
        e = jnp.exp(-logits)                          # EUP
        o_ref[...] = pl.reciprocal(1.0 + e, approx=True).astype(o_ref.dtype)


def _round_up(x, m):
    return ((x + m - 1) // m) * m


def _pick_tk(d_in, max_tk=2048):
    """Largest K tile: all of D_in if small, else a 128-aligned exact divisor."""
    if d_in <= max_tk:
        return d_in
    for tk in range(max_tk, 127, -128):
        if d_in % tk == 0:
            return tk
    return d_in  # fallback: single K block (may need a larger VMEM limit)


def _pick_tiles(batch, d_in, d_out_p, budget_bytes=24 * 1024 * 1024):
    tb = batch if batch <= 512 else 512
    tk = _pick_tk(d_in)

    def footprint(tb_, tk_):
        # double-buffered x / w / out blocks + single f32 accumulator
        return 4 * (2 * (tb_ * tk_ + d_out_p * tk_ + tb_ * d_out_p) + tb_ * d_out_p)

    while tb > 8 and footprint(tb, tk) > budget_bytes:
        tb = max(8, (tb // 2) // 8 * 8)
    return tb, tk


def logistic_regression(x, weight, bias):
    """x: (B, D_in) f32; weight: (D_out, D_in) f32 (PyTorch layout); bias: (D_out,) f32."""
    B, D_in = x.shape
    D_out = weight.shape[0]

    # Lane-dense output: pad the class dim up to a multiple of 128 so the
    # store path uses full-width vst instead of masked partial stores.
    D_out_p = _round_up(D_out, 128)
    if D_out_p != D_out:
        weight = jnp.pad(weight, ((0, D_out_p - D_out), (0, 0)))
        bias = jnp.pad(bias, (0, D_out_p - D_out))
    b2d = bias.reshape(1, D_out_p)

    TB, TK = _pick_tiles(B, D_in, D_out_p)
    grid = (pl.cdiv(B, TB), pl.cdiv(D_in, TK))

    cost = pl.CostEstimate(
        flops=2 * B * D_in * D_out,
        transcendentals=B * D_out,
        bytes_accessed=4 * (B * D_in + D_out * D_in + D_out + B * D_out),
    )

    out_p = pl.pallas_call(
        logreg_kernel,
        out_shape=jax.ShapeDtypeStruct((B, D_out_p), jnp.float32),
        grid_spec=pltpu.PrefetchScalarGridSpec(
            num_scalar_prefetch=0,
            grid=grid,
            in_specs=[
                pl.BlockSpec((TB, TK), lambda i, k: (i, k)),       # x tile
                pl.BlockSpec((D_out_p, TK), lambda i, k: (0, k)),  # weight (out, in)
                pl.BlockSpec((1, D_out_p), lambda i, k: (0, 0)),   # bias
            ],
            out_specs=pl.BlockSpec((TB, D_out_p), lambda i, k: (i, 0)),
            scratch_shapes=[pltpu.VMEM((TB, D_out_p), jnp.float32)],
        ),
        compiler_params=pltpu.CompilerParams(
            dimension_semantics=("parallel", "arbitrary"),
            vmem_limit_bytes=32 * 1024 * 1024,
        ),
        cost_estimate=cost,
    )(x, weight, b2d)

    return out_p[:, :D_out] if D_out_p != D_out else out_p


if __name__ == "__main__":
    # Small, deterministic example consistent with LogisticRegression(input_dim, output_dim)
    B, D_in, D_out = 8, 32, 8
    key = jax.random.PRNGKey(0)
    kx, kw, kb = jax.random.split(key, 3)

    x = jax.random.normal(kx, (B, D_in), dtype=jnp.float32)
    # Deterministic parameter init (PyTorch Linear-style uniform bound).
    bound = 1.0 / jnp.sqrt(jnp.float32(D_in))
    weight = jax.random.uniform(kw, (D_out, D_in), minval=-bound, maxval=bound, dtype=jnp.float32)
    bias = jax.random.uniform(kb, (D_out,), minval=-bound, maxval=bound, dtype=jnp.float32)

    out = jax.jit(logistic_regression)(x, weight, bias)
    jax.block_until_ready(out)

    # Reference check in plain JAX (approx-reciprocal epilogue => looser tol).
    ref = jax.nn.sigmoid(x @ weight.T + bias)
    assert out.shape == (B, D_out)
    assert jnp.allclose(out, ref, atol=2e-3, rtol=2e-3), float(jnp.max(jnp.abs(out - ref)))
    print("KERNEL_OK")
</pallas_src>

<mosaic_0001>
module attributes {stable_mosaic.version = 11 : i64} {
  func.func @logreg_kernel(%arg0: i32, %arg1: i32, %arg2: memref<8x32xf32, #tpu.memory_space<vmem>>, %arg3: memref<128x32xf32, #tpu.memory_space<vmem>>, %arg4: memref<1x128xf32, #tpu.memory_space<vmem>>, %arg5: memref<8x128xf32, #tpu.memory_space<vmem>>, %arg6: memref<8x128xf32, #tpu.memory_space<vmem>>) attributes {dimension_semantics = [#tpu.dimension_semantics<parallel>, #tpu.dimension_semantics<arbitrary>], iteration_bounds = array<i64: 1, 1>, scalar_prefetch = 0 : i64, scratch_operands = 1 : i64, tpu.core_type = #tpu.core_type<tc>, window_params = [{transform_indices = @transform_0, window_bounds = array<i64: 8, 32>}, {transform_indices = @transform_1, window_bounds = array<i64: 128, 32>}, {pipeline_mode = #tpu.pipeline_mode<synchronous>, transform_indices = @transform_2, window_bounds = array<i64: 1, 128>}, {transform_indices = @transform_3, window_bounds = array<i64: 8, 128>}]} {
    %c0_i32 = arith.constant 0 : i32
    %0 = arith.cmpi eq, %arg1, %c0_i32 : i32
    %1 = arith.extui %0 : i1 to i32
    %c0_i32_0 = arith.constant 0 : i32
    %2 = arith.cmpi ne, %1, %c0_i32_0 : i32
    scf.if %2 {
      %cst_10 = arith.constant 0.000000e+00 : f32
      %12 = vector.broadcast %cst_10 : f32 to vector<8x128xf32>
      %c0_11 = arith.constant 0 : index
      %c0_12 = arith.constant 0 : index
      %13 = vector.load %arg6[%c0_11, %c0_12] : memref<8x128xf32, #tpu.memory_space<vmem>>, vector<8x128xf32>
      tpu.vector_store %arg6[%c0_11, %c0_12], %12 {strides = array<i32>} : memref<8x128xf32, #tpu.memory_space<vmem>>, vector<8x128xf32>,
    } else {
    }
    %c0 = arith.constant 0 : index
    %c0_1 = arith.constant 0 : index
    %3 = vector.load %arg6[%c0, %c0_1] : memref<8x128xf32, #tpu.memory_space<vmem>>, vector<8x128xf32>
    %c0_2 = arith.constant 0 : index
    %c0_3 = arith.constant 0 : index
    %4 = vector.load %arg2[%c0_2, %c0_3] : memref<8x32xf32, #tpu.memory_space<vmem>>, vector<8x32xf32>
    %c0_4 = arith.constant 0 : index
    %c0_5 = arith.constant 0 : index
    %5 = vector.load %arg3[%c0_4, %c0_5] : memref<128x32xf32, #tpu.memory_space<vmem>>, vector<128x32xf32>
    %cst = arith.constant dense<0.000000e+00> : vector<8x128xf32>
    %6 = tpu.matmul %4, %5, %cst {dimension_numbers = #tpu.dot_dimension_numbers<[1], [1], [0], [0], [0, 0, 1, 0], [], []>} : vector<8x32xf32>, vector<128x32xf32>, vector<8x128xf32> -> vector<8x128xf32>
    %7 = arith.addf %3, %6 : vector<8x128xf32>
    %c0_6 = arith.constant 0 : index
    %c0_7 = arith.constant 0 : index
    %8 = vector.load %arg6[%c0_6, %c0_7] : memref<8x128xf32, #tpu.memory_space<vmem>>, vector<8x128xf32>
    tpu.vector_store %arg6[%c0_6, %c0_7], %7 {strides = array<i32>} : memref<8x128xf32, #tpu.memory_space<vmem>>, vector<8x128xf32>,
    %c0_i32_8 = arith.constant 0 : i32
    %9 = arith.cmpi eq, %arg1, %c0_i32_8 : i32
    %10 = arith.extui %9 : i1 to i32
    %c0_i32_9 = arith.constant 0 : i32
    %11 = arith.cmpi ne, %10, %c0_i32_9 : i32
    scf.if %11 {
      %c0_10 = arith.constant 0 : index
      %c0_11 = arith.constant 0 : index
      %12 = vector.load %arg6[%c0_10, %c0_11] : memref<8x128xf32, #tpu.memory_space<vmem>>, vector<8x128xf32>
      %c0_12 = arith.constant 0 : index
      %c0_13 = arith.constant 0 : index
      %13 = vector.load %arg4[%c0_12, %c0_13] : memref<1x128xf32, #tpu.memory_space<vmem>>, vector<1x128xf32>
      %14 = vector.broadcast %13 : vector<1x128xf32> to vector<8x128xf32>
      %15 = arith.addf %12, %14 : vector<8x128xf32>
      %cst_14 = arith.constant 0.000000e+00 : f32
      %16 = vector.broadcast %cst_14 : f32 to vector<8x128xf32>
      %17 = arith.subf %16, %15 : vector<8x128xf32>
      %18 = math.exp %17 : vector<8x128xf32>
      %cst_15 = arith.constant 1.000000e+00 : f32
      %19 = vector.broadcast %cst_15 : f32 to vector<8x128xf32>
      %20 = arith.addf %19, %18 : vector<8x128xf32>
      %21 = tpu.reciprocal %20 {approx = true} : vector<8x128xf32> -> vector<8x128xf32>
      %c0_16 = arith.constant 0 : index
      %c0_17 = arith.constant 0 : index
      %22 = vector.load %arg5[%c0_16, %c0_17] : memref<8x128xf32, #tpu.memory_space<vmem>>, vector<8x128xf32>
      tpu.vector_store %arg5[%c0_16, %c0_17], %21 {strides = array<i32>} : memref<8x128xf32, #tpu.memory_space<vmem>>, vector<8x128xf32>,
    } else {
    }
    return
  }
  func.func @transform_0(%arg0: i32, %arg1: i32) -> (i32, i32) {
    %c0_i32 = arith.constant 0 : i32
    return %arg0, %arg1 : i32, i32
  }
  func.func @transform_1(%arg0: i32, %arg1: i32) -> (i32, i32) {
    %c0_i32 = arith.constant 0 : i32
    %c0_i32_0 = arith.constant 0 : i32
    return %c0_i32, %arg1 : i32, i32
  }
  func.func @transform_2(%arg0: i32, %arg1: i32) -> (i32, i32) {
    %c0_i32 = arith.constant 0 : i32
    %c0_i32_0 = arith.constant 0 : i32
    %c0_i32_1 = arith.constant 0 : i32
    return %c0_i32, %c0_i32_0 : i32, i32
  }
  func.func @transform_3(%arg0: i32, %arg1: i32) -> (i32, i32) {
    %c0_i32 = arith.constant 0 : i32
    %c0_i32_0 = arith.constant 0 : i32
    return %arg0, %c0_i32 : i32, i32
  }
}

</mosaic_0001>

<bundles_post_ra>
// kernel: logistic_regression.1
= control target key start
LH: loop header
LB: loop body
LE: loop exit
PB: predicated region body
PF: predicated region fallthrough
CT: control target
= control target key end

     0   :  { %vm38_vm0 = vcmask 261120   ;;  %s287_s0 = inlined_call_operand.vmem [shape: f32[8,32], index: 0, kind: input, shape index: {}]   ;;  %s288_s1 = inlined_call_operand.vmem [shape: f32[128,32], index: 1, kind: input, shape index: {}]   ;;  %s289_s2 = inlined_call_operand.vmem [shape: f32[1,128], index: 2, kind: input, shape index: {}]   ;;  %s290_s3 = inlined_call_operand.hbm [shape: f32[8,128], index: 3, kind: output, shape index: {}]  }
   0x1   :  { %v37_v0 = vld [vmem:[%s288_s1 + $0x78] sm:$0xff]  ;;  %v36_v1 = vld [vmem:[%s288_s1 + $0x70] sm:$0xff] }
   0x2   :  { %143 = vmatpush.xpose.msk.msra.mxu0 %vm38_vm0, %v37_v0 }
   0x3   :  { %8 = vsyncpa [#allocation4], 0  ;;  %v35_v2 = vld [vmem:[%s288_s1 + $0x68] sm:$0xff]  ;;  %v34_v3 = vld [vmem:[%s288_s1 + $0x60] sm:$0xff] }
   0x4   :  { %v33_v4 = vld [vmem:[%s288_s1 + $0x58] sm:$0xff]  ;;  %v32_v5 = vld [vmem:[%s288_s1 + $0x50] sm:$0xff]  ;;  %v31_v6 = vld [vmem:[%s288_s1 + $0x48] sm:$0xff] }
   0x5   :  { %v30_v7 = vld [vmem:[%s288_s1 + $0x40] sm:$0xff]  ;;  %v29_v8 = vld [vmem:[%s288_s1 + $0x38] sm:$0xff]  ;;  %v28_v9 = vld [vmem:[%s288_s1 + $0x30] sm:$0xff] }
   0x6   :  { %144 = vmatpush.xpose.msk.msra.mxu0 %vm38_vm0, %v36_v1  ;;  %v27_v10 = vld [vmem:[%s288_s1 + $0x28] sm:$0xff]  ;;  %v26_v11 = vld [vmem:[%s288_s1 + $0x20] sm:$0xff]  ;;  %v25_v12 = vld [vmem:[%s288_s1 + $0x18] sm:$0xff] }
   0x7   :  { %v24_v13 = vld [vmem:[%s288_s1 + $0x10] sm:$0xff]  ;;  %v23_v14 = vld [vmem:[%s288_s1 + $0x8] sm:$0xff]  ;;  %v22_v15 = vld [vmem:[%s288_s1] sm:$0xff]  ;;  %s192_s1 = smov [#allocation3]  }
   0x8   :  { %v21_v16 = vld [vmem:[%s287_s0] sm:$0xff]  ;;  %s132_s21 = sshll.u32 %s192_s1, 4  ;;  %s134_s0 = sshll.u32 %s290_s3, 4  ;;  %s133_s21 = int_to_ptr.vmem [resolvable:$true] %s132_s21  ;;  %s135_s0 = int_to_ptr.hbm [resolvable:$true] %s134_s0 }
   0x9   :  { %v161_v17 = vld [vmem:[%s289_s2] ss:$0 sm:$0xff] }
   0xa   :  { %145 = vmatpush.xpose.msk.msra.mxu0 %vm38_vm0, %v35_v2 }
   0xe   :  { %146 = vmatpush.xpose.msk.msra.mxu0 %vm38_vm0, %v34_v3 }
  0x12   :  { %147 = vmatpush.xpose.msk.msra.mxu0 %vm38_vm0, %v33_v4 }
  0x16   :  { %148 = vmatpush.xpose.msk.msra.mxu0 %vm38_vm0, %v32_v5 }
  0x1a   :  { %149 = vmatpush.xpose.msk.msra.mxu0 %vm38_vm0, %v31_v6 }
  0x1e   :  { %150 = vmatpush.xpose.msk.msra.mxu0 %vm38_vm0, %v30_v7 }
  0x22   :  { %151 = vmatpush.xpose.msk.msra.mxu0 %vm38_vm0, %v29_v8 }
  0x26   :  { %152 = vmatpush.xpose.msk.msra.mxu0 %vm38_vm0, %v28_v9 }
  0x2a   :  { %153 = vmatpush.xpose.msk.msra.mxu0 %vm38_vm0, %v27_v10 }
  0x2e   :  { %154 = vmatpush.xpose.msk.msra.mxu0 %vm38_vm0, %v26_v11 }
  0x32   :  { %155 = vmatpush.xpose.msk.msra.mxu0 %vm38_vm0, %v25_v12 }
  0x36   :  { %156 = vmatpush.xpose.msk.msra.mxu0 %vm38_vm0, %v24_v13 }
  0x3a   :  { %157 = vmatpush.xpose.msk.msra.mxu0 %vm38_vm0, %v23_v14 }
  0x3e   :  { %158 = vmatpush.xpose.msk.msra.mxu0 %vm38_vm0, %v22_v15 }
  0x41   :  { %159 = vmatmul.msk.f32.vlgmr.msra.gmra.mxu0 %vm38_vm0, %v21_v16 }
  0xbe   :  { %v107_v18 = vpop.f32.mrf.mxu0 }
  0xbf   :  { %v120_v19 = vadd.f32 %v161_v17, %v107_v18 }
  0xc1   :  { %v121_v20 = vsub.f32 0.0, %v120_v19 }
  0xc3   :  { %v122_v21 = vmul.f32 1.442695, %v121_v20 }
  0xc5   :  { %162 = vpow2.f32 %v122_v21 }
  0xcb   :  { %v163_v22 = vpop.eup %162 }
  0xcc   :  { %v124_v23 = vadd.f32 1.0, %v163_v22 }
  0xce   :  { %164 = vrcp.f32 %v124_v23 }
  0xd4   :  { %v165_v24 = vpop.eup %164 }
  0xd5   :  { %126 = vst [vmem:[#allocation3] sm:$0xff] %v165_v24 }
  0xd6   :  { %137 = dma.vmem_to_hbm [thread:$0]  %s133_s21, 128, %s135_s0, [#allocation4]  }
  0xd7   :  { %190 = dma.done.wait [#allocation4], 128  }
  0xd8   :  { %191 = vsyncadd [#allocation4], 4294967168 }
  0xd9   :  { %142 = vsyncpa [#allocation4], 1 }

</bundles_post_ra>
